<compile_context>
chip_gen: v7x
topology: tpu7x:2x2x1
jax: 0.10.0
libtpu: 0.0.40
codegen_flags: <defaults>
</compile_context>

<pallas_src>
import functools

import jax
import jax.numpy as jnp
from jax.experimental import pallas as pl
from jax.experimental.pallas import tpu as pltpu

HIDDEN_SIZE = 32   # hp.HIDDEN_SIZE (synthetic choice; 3H = 96 rows, 8-aligned)
NUM_LAYERS = 2     # hp.NUM_LAYERS  (synthetic choice)
INPUT_SIZE = 2
LANE = 128
CHUNK = 256        # lanes per inner chunk (2 vregs wide per 8-row group)
ROWS_IN = 8        # input slab rows: (x, t, 1, 0,0,0,0,0) — aligned MXU K dim


def _round_up(a, b):
    return ((a + b - 1) // b) * b


def _cell_from_gates(gates):
    """gates: [3H, C] with rows [i (pre-halved); g; o (pre-halved)].
    sigmoid(z) = 0.5*tanh(0.5 z) + 0.5; the 0.5*z is folded into the weights,
    so only `0.5*tanh(.) + 0.5` remains.  Forget gate already pruned (c0==0)."""
    H = HIDDEN_SIZE
    i = 0.5 * jnp.tanh(gates[0 * H:1 * H, :]) + 0.5
    g = jnp.tanh(gates[1 * H:2 * H, :])
    o = 0.5 * jnp.tanh(gates[2 * H:3 * H, :]) + 0.5
    return o * jnp.tanh(i * g)                  # [H, C]


def _lstm_pinn_kernel(xt1_ref, w0_ref, w1_ref, b1_ref, wfc_ref, bfc_ref,
                      out_ref, *, tile_n, chunk):
    bfc = bfc_ref[0]                            # fc bias scalar from SMEM
    # Walk the tile in lane chunks: static slices (zero index cost), per-chunk
    # working set stays within the vreg file, no [96, tile_n] VMEM spills.
    for ci in range(tile_n // chunk):
        off = ci * chunk
        xt1 = xt1_ref[:, off:off + chunk]       # [8, C], rows = (x, t, 1, 0..)

        # Layer 0 on the MXU; bias rides in via the ones row: [3H,8] @ [8,C].
        gates0 = jnp.dot(w0_ref[...], xt1, preferred_element_type=jnp.float32)
        h0 = _cell_from_gates(gates0)           # [H, C]

        # Layer 1: [3H, H] @ [H, C] on the MXU.
        gates1 = (jnp.dot(w1_ref[...], h0, preferred_element_type=jnp.float32)
                  + b1_ref[...])
        h1 = _cell_from_gates(gates1)           # [H, C]

        # Final Linear(H, 1): [1, H] @ [H, C] -> lane-dense [1, C] row.
        u = jnp.dot(wfc_ref[...], h1, preferred_element_type=jnp.float32) + bfc
        out_ref[:, off:off + chunk] = u.astype(out_ref.dtype)


def _prepare_params(params):
    """Host-side (traced) prep: prune forget-gate rows, fold the sigmoid 0.5
    pre-scale into the i/o rows (exact in f32), pack layer 0's weights + bias
    into one [3H, ROWS_IN] matrix for the ones-row MXU trick."""
    H = HIDDEN_SIZE
    w0, b0, w1, b1, wfc, bfc = params

    def prune_and_prescale(m):                  # [4H, ...] -> [3H, ...]
        return jnp.concatenate([0.5 * m[0 * H:1 * H],   # i (pre-halved)
                                m[2 * H:3 * H],          # g
                                0.5 * m[3 * H:4 * H]],   # o (pre-halved)
                               axis=0)

    w0p = prune_and_prescale(w0)                          # [3H, 2]
    b0p = prune_and_prescale(b0)                          # [3H, 1]
    w0_aug = jnp.concatenate([w0p, b0p], axis=1)          # [3H, 3]
    w0_aug = jnp.pad(w0_aug, ((0, 0), (0, ROWS_IN - 3)))  # [3H, 8] (zero cols)
    w1p = prune_and_prescale(w1)                          # [3H, H]
    b1p = prune_and_prescale(b1)                          # [3H, 1]
    return w0_aug, w1p, b1p, wfc, bfc


@functools.partial(jax.jit, static_argnames=("max_tile_n",))
def lstm_pinn_forward(x, t, params, *, max_tile_n=4096):
    """x, t: [N, 1] float32.  Returns u_pred: [N, 1] float32."""
    N = x.shape[0]
    H = HIDDEN_SIZE
    w0_aug, w1, b1, wfc, bfc = _prepare_params(params)

    # Batch-in-lanes input slab [8, N]: rows (x, t, 1, zeros...) — the ones
    # row carries the layer-0 bias through the MXU, padding rows keep K = 8.
    xt1 = jnp.concatenate([x.astype(jnp.float32).reshape(1, N),
                           t.astype(jnp.float32).reshape(1, N),
                           jnp.ones((1, N), jnp.float32),
                           jnp.zeros((ROWS_IN - 3, N), jnp.float32)], axis=0)

    # Tile / grid selection (all static under jit):
    #  * large tiles (<= max_tile_n lanes) to amortize per-grid-step overhead;
    #  * tile divisible by the in-kernel chunk size;
    #  * only when there is more than one grid step, round the step count up
    #    to an even number so both v7x TensorCores get work ("parallel" axis).
    max_tile_n = max(CHUNK, _round_up(max_tile_n, CHUNK))
    if N <= CHUNK:
        tile_n = _round_up(max(N, 1), LANE)     # 128 or 256, single step
        chunk = tile_n
        steps = 1
    else:
        tile_n = min(max_tile_n, _round_up(pl.cdiv(N, 2), CHUNK))
        chunk = CHUNK
        steps = pl.cdiv(N, tile_n)
        steps += steps % 2                      # even (>= 2) steps for v7x
    Np = steps * tile_n
    if Np != N:
        xt1 = jnp.pad(xt1, ((0, 0), (0, Np - N)))  # padded lanes: finite junk

    full = lambda i: (0, 0)                     # weights: VMEM-resident
    row = lambda i: (0, i)                      # batch tiles along lanes

    kernel = functools.partial(_lstm_pinn_kernel, tile_n=tile_n, chunk=chunk)
    out = pl.pallas_call(
        kernel,
        out_shape=jax.ShapeDtypeStruct((1, Np), jnp.float32),
        grid=(steps,),
        in_specs=[
            pl.BlockSpec((ROWS_IN, tile_n), row),               # [x; t; 1] slab
            pl.BlockSpec((3 * H, ROWS_IN), full),               # layer-0 W|b (pruned, pre-scaled)
            pl.BlockSpec((3 * H, H), full),                     # layer-1 W_ih (pruned, pre-scaled)
            pl.BlockSpec((3 * H, 1), full),                     # layer-1 b_ih + b_hh
            pl.BlockSpec((1, H), full),                         # fc weight [1, H]
            pl.BlockSpec(memory_space=pltpu.MemorySpace.SMEM),  # fc bias scalar
        ],
        out_specs=pl.BlockSpec((1, tile_n), row),               # lane-dense row
        compiler_params=pltpu.CompilerParams(
            dimension_semantics=("parallel",),
            vmem_limit_bytes=32 * 1024 * 1024),
    )(xt1, w0_aug, w1, b1, wfc, bfc)

    return out[:, :N].T                         # [N, 1]


def init_params(key):
    """Deterministic synthetic parameters in native PyTorch layouts:
    W_ih_l{k}: [4H, in_dim], fc.weight: [1, H].  b_ih + b_hh are pre-summed
    into a single [4H, 1] column per layer (they are always added together).
    W_hh_l{k} are omitted on purpose: seq_len == 1 with h0 == 0 makes their
    contribution exactly zero in this forward pass."""
    H = HIDDEN_SIZE
    k = 1.0 / jnp.sqrt(H)
    keys = jax.random.split(key, 8)
    u = lambda kk, shape: jax.random.uniform(kk, shape, jnp.float32, -k, k)

    w0 = u(keys[0], (4 * H, INPUT_SIZE))                    # W_ih_l0
    b0 = u(keys[1], (4 * H, 1)) + u(keys[2], (4 * H, 1))    # b_ih_l0 + b_hh_l0
    w1 = u(keys[3], (4 * H, H))                             # W_ih_l1
    b1 = u(keys[4], (4 * H, 1)) + u(keys[5], (4 * H, 1))    # b_ih_l1 + b_hh_l1
    wfc = u(keys[6], (1, H))                                # fc.weight
    bfc = u(keys[7], (1,))                                  # fc.bias
    return (w0, b0, w1, b1, wfc, bfc)


def _reference(x, t, params):
    """Pure-JAX reference of the same degenerate (seq_len == 1) LSTM forward,
    using the unpruned, unscaled PyTorch-layout parameters."""
    H = HIDDEN_SIZE
    w0, b0, w1, b1, wfc, bfc = params
    xt = jnp.concatenate([x, t], axis=-1)                   # [N, 2]

    def cell(x_in, w, b):
        gates = x_in @ w.T + b[:, 0]                        # [N, 4H]
        i = jax.nn.sigmoid(gates[:, 0 * H:1 * H])
        g = jnp.tanh(gates[:, 2 * H:3 * H])
        o = jax.nn.sigmoid(gates[:, 3 * H:4 * H])
        return o * jnp.tanh(i * g)

    h = cell(xt, w0, b0)
    h = cell(h, w1, b1)
    return h @ wfc.T + bfc[0]                               # [N, 1]


if __name__ == "__main__":
    key = jax.random.PRNGKey(0)
    k_x, k_t, k_p = jax.random.split(key, 3)
    params = init_params(k_p)

    # Primary small check (single grid step, single chunk).
    N = 16
    x = jax.random.uniform(k_x, (N, 1), jnp.float32, -1.0, 1.0)
    t = jax.random.uniform(k_t, (N, 1), jnp.float32, 0.0, 1.0)
    u_pred = lstm_pinn_forward(x, t, params)
    jax.block_until_ready(u_pred)
    assert u_pred.shape == (N, 1) and u_pred.dtype == jnp.float32
    u_ref = _reference(x, t, params)
    assert jnp.allclose(u_pred, u_ref, atol=1e-5, rtol=1e-5), (
        float(jnp.max(jnp.abs(u_pred - u_ref))))

    # Secondary check exercising the multi-step grid, in-kernel chunk loop
    # and lane padding paths.
    N2 = 600
    x2 = jax.random.uniform(k_x, (N2, 1), jnp.float32, -1.0, 1.0)
    t2 = jax.random.uniform(k_t, (N2, 1), jnp.float32, 0.0, 1.0)
    u2 = lstm_pinn_forward(x2, t2, params)
    jax.block_until_ready(u2)
    u2_ref = _reference(x2, t2, params)
    assert jnp.allclose(u2, u2_ref, atol=1e-5, rtol=1e-5), (
        float(jnp.max(jnp.abs(u2 - u2_ref))))

    print("KERNEL_OK")
</pallas_src>

<mosaic_0001>
module attributes {stable_mosaic.version = 11 : i64} {
  func.func @_lstm_pinn_kernel(%arg0: i32, %arg1: memref<8x128xf32, #tpu.memory_space<vmem>>, %arg2: memref<96x8xf32, #tpu.memory_space<vmem>>, %arg3: memref<96x32xf32, #tpu.memory_space<vmem>>, %arg4: memref<96x1xf32, #tpu.memory_space<vmem>>, %arg5: memref<1x32xf32, #tpu.memory_space<vmem>>, %arg6: memref<1xf32, #tpu.memory_space<smem>>, %arg7: memref<1x128xf32, #tpu.memory_space<vmem>>) attributes {dimension_semantics = [#tpu.dimension_semantics<parallel>], iteration_bounds = array<i64: 1>, scalar_prefetch = 0 : i64, scratch_operands = 0 : i64, tpu.core_type = #tpu.core_type<tc>, window_params = [{transform_indices = @transform_0, window_bounds = array<i64: 8, 128>}, {pipeline_mode = #tpu.pipeline_mode<synchronous>, transform_indices = @transform_1, window_bounds = array<i64: 96, 8>}, {pipeline_mode = #tpu.pipeline_mode<synchronous>, transform_indices = @transform_2, window_bounds = array<i64: 96, 32>}, {pipeline_mode = #tpu.pipeline_mode<synchronous>, transform_indices = @transform_3, window_bounds = array<i64: 96, 1>}, {pipeline_mode = #tpu.pipeline_mode<synchronous>, transform_indices = @transform_4, window_bounds = array<i64: 1, 32>}, {transform_indices = @transform_5, window_bounds = array<i64: 1>}, {transform_indices = @transform_6, window_bounds = array<i64: 1, 128>}]} {
    %c0 = arith.constant 0 : index
    %0 = memref.load %arg6[%c0] : memref<1xf32, #tpu.memory_space<smem>>
    %c0_0 = arith.constant 0 : index
    %c0_1 = arith.constant 0 : index
    %1 = vector.load %arg1[%c0_0, %c0_1] : memref<8x128xf32, #tpu.memory_space<vmem>>, vector<8x128xf32>
    %c0_2 = arith.constant 0 : index
    %c0_3 = arith.constant 0 : index
    %2 = vector.load %arg2[%c0_2, %c0_3] : memref<96x8xf32, #tpu.memory_space<vmem>>, vector<96x8xf32>
    %cst = arith.constant dense<0.000000e+00> : vector<96x128xf32>
    %3 = tpu.matmul %2, %1, %cst {dimension_numbers = #tpu.dot_dimension_numbers<[1], [0], [0], [1], [0, 0, 1, 1], [], []>} : vector<96x8xf32>, vector<8x128xf32>, vector<96x128xf32> -> vector<96x128xf32>
    %4 = vector.extract_strided_slice %3 {offsets = [0, 0], sizes = [32, 128], strides = [1, 1]} : vector<96x128xf32> to vector<32x128xf32>
    %5 = math.tanh %4 : vector<32x128xf32>
    %cst_4 = arith.constant 5.000000e-01 : f32
    %6 = vector.broadcast %cst_4 : f32 to vector<32x128xf32>
    %7 = arith.mulf %6, %5 : vector<32x128xf32>
    %cst_5 = arith.constant 5.000000e-01 : f32
    %8 = vector.broadcast %cst_5 : f32 to vector<32x128xf32>
    %9 = arith.addf %7, %8 : vector<32x128xf32>
    %10 = vector.extract_strided_slice %3 {offsets = [32, 0], sizes = [32, 128], strides = [1, 1]} : vector<96x128xf32> to vector<32x128xf32>
    %11 = math.tanh %10 : vector<32x128xf32>
    %12 = vector.extract_strided_slice %3 {offsets = [64, 0], sizes = [32, 128], strides = [1, 1]} : vector<96x128xf32> to vector<32x128xf32>
    %13 = math.tanh %12 : vector<32x128xf32>
    %cst_6 = arith.constant 5.000000e-01 : f32
    %14 = vector.broadcast %cst_6 : f32 to vector<32x128xf32>
    %15 = arith.mulf %14, %13 : vector<32x128xf32>
    %cst_7 = arith.constant 5.000000e-01 : f32
    %16 = vector.broadcast %cst_7 : f32 to vector<32x128xf32>
    %17 = arith.addf %15, %16 : vector<32x128xf32>
    %18 = arith.mulf %9, %11 : vector<32x128xf32>
    %19 = math.tanh %18 : vector<32x128xf32>
    %20 = arith.mulf %17, %19 : vector<32x128xf32>
    %c0_8 = arith.constant 0 : index
    %c0_9 = arith.constant 0 : index
    %21 = vector.load %arg3[%c0_8, %c0_9] : memref<96x32xf32, #tpu.memory_space<vmem>>, vector<96x32xf32>
    %cst_10 = arith.constant dense<0.000000e+00> : vector<96x128xf32>
    %22 = tpu.matmul %21, %20, %cst_10 {dimension_numbers = #tpu.dot_dimension_numbers<[1], [0], [0], [1], [0, 0, 1, 1], [], []>} : vector<96x32xf32>, vector<32x128xf32>, vector<96x128xf32> -> vector<96x128xf32>
    %c0_11 = arith.constant 0 : index
    %c0_12 = arith.constant 0 : index
    %23 = vector.load %arg4[%c0_11, %c0_12] : memref<96x1xf32, #tpu.memory_space<vmem>>, vector<96x1xf32>
    %24 = vector.broadcast %23 : vector<96x1xf32> to vector<96x128xf32>
    %25 = arith.addf %22, %24 : vector<96x128xf32>
    %26 = vector.extract_strided_slice %25 {offsets = [0, 0], sizes = [32, 128], strides = [1, 1]} : vector<96x128xf32> to vector<32x128xf32>
    %27 = math.tanh %26 : vector<32x128xf32>
    %cst_13 = arith.constant 5.000000e-01 : f32
    %28 = vector.broadcast %cst_13 : f32 to vector<32x128xf32>
    %29 = arith.mulf %28, %27 : vector<32x128xf32>
    %cst_14 = arith.constant 5.000000e-01 : f32
    %30 = vector.broadcast %cst_14 : f32 to vector<32x128xf32>
    %31 = arith.addf %29, %30 : vector<32x128xf32>
    %32 = vector.extract_strided_slice %25 {offsets = [32, 0], sizes = [32, 128], strides = [1, 1]} : vector<96x128xf32> to vector<32x128xf32>
    %33 = math.tanh %32 : vector<32x128xf32>
    %34 = vector.extract_strided_slice %25 {offsets = [64, 0], sizes = [32, 128], strides = [1, 1]} : vector<96x128xf32> to vector<32x128xf32>
    %35 = math.tanh %34 : vector<32x128xf32>
    %cst_15 = arith.constant 5.000000e-01 : f32
    %36 = vector.broadcast %cst_15 : f32 to vector<32x128xf32>
    %37 = arith.mulf %36, %35 : vector<32x128xf32>
    %cst_16 = arith.constant 5.000000e-01 : f32
    %38 = vector.broadcast %cst_16 : f32 to vector<32x128xf32>
    %39 = arith.addf %37, %38 : vector<32x128xf32>
    %40 = arith.mulf %31, %33 : vector<32x128xf32>
    %41 = math.tanh %40 : vector<32x128xf32>
    %42 = arith.mulf %39, %41 : vector<32x128xf32>
    %c0_17 = arith.constant 0 : index
    %c0_18 = arith.constant 0 : index
    %43 = vector.load %arg5[%c0_17, %c0_18] : memref<1x32xf32, #tpu.memory_space<vmem>>, vector<1x32xf32>
    %cst_19 = arith.constant dense<0.000000e+00> : vector<1x128xf32>
    %44 = tpu.matmul %43, %42, %cst_19 {dimension_numbers = #tpu.dot_dimension_numbers<[1], [0], [0], [1], [0, 0, 1, 1], [], []>} : vector<1x32xf32>, vector<32x128xf32>, vector<1x128xf32> -> vector<1x128xf32>
    %45 = vector.broadcast %0 : f32 to vector<1x128xf32>
    %46 = arith.addf %44, %45 : vector<1x128xf32>
    %c0_20 = arith.constant 0 : index
    %c0_21 = arith.constant 0 : index
    %47 = vector.load %arg7[%c0_20, %c0_21] : memref<1x128xf32, #tpu.memory_space<vmem>>, vector<1x128xf32>
    tpu.vector_store %arg7[%c0_20, %c0_21], %46 {strides = array<i32>} : memref<1x128xf32, #tpu.memory_space<vmem>>, vector<1x128xf32>,
    return
  }
  func.func @transform_0(%arg0: i32) -> (i32, i32) {
    %c0_i32 = arith.constant 0 : i32
    %c0_i32_0 = arith.constant 0 : i32
    return %c0_i32, %arg0 : i32, i32
  }
  func.func @transform_1(%arg0: i32) -> (i32, i32) {
    %c0_i32 = arith.constant 0 : i32
    %c0_i32_0 = arith.constant 0 : i32
    %c0_i32_1 = arith.constant 0 : i32
    return %c0_i32, %c0_i32_0 : i32, i32
  }
  func.func @transform_2(%arg0: i32) -> (i32, i32) {
    %c0_i32 = arith.constant 0 : i32
    %c0_i32_0 = arith.constant 0 : i32
    %c0_i32_1 = arith.constant 0 : i32
    return %c0_i32, %c0_i32_0 : i32, i32
  }
  func.func @transform_3(%arg0: i32) -> (i32, i32) {
    %c0_i32 = arith.constant 0 : i32
    %c0_i32_0 = arith.constant 0 : i32
    %c0_i32_1 = arith.constant 0 : i32
    return %c0_i32, %c0_i32_0 : i32, i32
  }
  func.func @transform_4(%arg0: i32) -> (i32, i32) {
    %c0_i32 = arith.constant 0 : i32
    %c0_i32_0 = arith.constant 0 : i32
    %c0_i32_1 = arith.constant 0 : i32
    return %c0_i32, %c0_i32_0 : i32, i32
  }
  func.func @transform_5(%arg0: i32) -> i32 {
    %c0_i32 = arith.constant 0 : i32
    %c0_i32_0 = arith.constant 0 : i32
    return %c0_i32 : i32
  }
  func.func @transform_6(%arg0: i32) -> (i32, i32) {
    %c0_i32 = arith.constant 0 : i32
    %c0_i32_0 = arith.constant 0 : i32
    return %c0_i32, %arg0 : i32, i32
  }
}

</mosaic_0001>

<bundles_post_ra>
// kernel: lstm_pinn_forward.1
= control target key start
LH: loop header
LB: loop body
LE: loop exit
PB: predicated region body
PF: predicated region fallthrough
CT: control target
= control target key end

     0   :  { %vm38_vm0 = vcmask 64512   ;;  %vm324_vm1 = vcmask 261120   ;;  %v806_v14 = vmov 0   ;;  %vm808_vm2 = vmmov 0   ;;  %s992_s0 = inlined_call_operand.vmem [shape: f32[8,128], index: 0, kind: input, shape index: {}]   ;;  %s993_s1 = inlined_call_operand.vmem [shape: f32[96,8], index: 1, kind: input, shape index: {}]   ;;  %s994_s2 = inlined_call_operand.vmem [shape: f32[96,32], index: 2, kind: input, shape index: {}]   ;;  %s995_s3 = inlined_call_operand.vmem [shape: f32[96,1], index: 3, kind: input, shape index: {}]   ;;  %s996_s4 = inlined_call_operand.vmem [shape: f32[1,32], index: 4, kind: input, shape index: {}]   ;;  %s997_s5 = inlined_call_operand.<no memory space> [shape: f32[1], index: 5, kind: input, shape index: {}]   ;;  %s998_s6 = inlined_call_operand.vmem [shape: f32[1,128], index: 6, kind: output, shape index: {}]  }
   0x1   :  { %v25_v0 = vld [vmem:[%s992_s0] sm:$0xff]  ;;  %v27_v2 = vld [vmem:[%s993_s1 + $0x8] sm:$0xff]  ;;  %v28_v3 = vld [vmem:[%s993_s1 + $0x10] sm:$0xff]  ;;  %741 = vset.pattern.permute.xlu1 %v806_v14  ;;  %740 = vset.pattern.permute.xlu0 %v806_v14 }
   0x2   :  { %v26_v1 = vld [vmem:[%s993_s1] sm:$0xff]  ;;  %665 = vmatprep.subr.mxu0 %v25_v0  ;;  %v29_v4 = vld [vmem:[%s993_s1 + $0x18] sm:$0xff]  ;;  %v31_v6 = vld [vmem:[%s993_s1 + $0x28] sm:$0xff] }
   0x3   :  { %667 = vmatprep.mubr.msk.f32.mxu0 %vm38_vm0, %v26_v1  ;;  %666 = vmatpush3.msra.mxu0 %v25_v0  ;;  %v30_v5 = vld [vmem:[%s993_s1 + $0x20] sm:$0xff]  ;;  %v32_v7 = vld [vmem:[%s993_s1 + $0x30] sm:$0xff]  ;;  %v33_v8 = vld [vmem:[%s993_s1 + $0x38] sm:$0xff] }
   0x4   :  { %668 = vmatmul.mubr.msk.f32.vlgmr.msra.gmra.mrb[0].mxu0 %vm38_vm0, %v27_v2  ;;  %v34_v9 = vld [vmem:[%s993_s1 + $0x40] sm:$0xff]  ;;  %v35_v10 = vld [vmem:[%s993_s1 + $0x48] sm:$0xff]  ;;  %v36_v11 = vld [vmem:[%s993_s1 + $0x50] sm:$0xff] }
   0x5   :  { %670 = vmatprep.mubr.msk.f32.mxu0 %vm38_vm0, %v28_v3  ;;  %v37_v12 = vld [vmem:[%s993_s1 + $0x58] sm:$0xff]  ;;  %v240_v13 = vld [vmem:[%s994_s2] sm:$0xff]  ;;  %v254_v15 = vld [vmem:[%s995_s3 + $0x10] sm:$0xff] }
   0x6   :  { %693 = vmatprep.mubr.msk.f32.mxu1 %vm324_vm1, %v240_v13  ;;  %v252_v16 = vld [vmem:[%s995_s3] sm:$0xff]  ;;  %276 = vperm.xlu1 %741, %v254_v15   ;;  %v255_v17 = vld [vmem:[%s995_s3 + $0x18] sm:$0xff]  ;;  %v253_v18 = vld [vmem:[%s995_s3 + $0x8] sm:$0xff] }
   0x7   :  { %266 = vperm.xlu0 %740, %v252_v16   ;;  %v257_v19 = vld [vmem:[%s995_s3 + $0x28] sm:$0xff]  ;;  %v256_v20 = vld [vmem:[%s995_s3 + $0x20] sm:$0xff]  ;;  %v259_v21 = vld [vmem:[%s995_s3 + $0x38] sm:$0xff] }
   0x8   :  { %671 = vmatmul.mubr.msk.f32.gmra.mrb[2].mxu0 %vm38_vm0, %v29_v4  ;;  %v258_v22 = vld [vmem:[%s995_s3 + $0x30] sm:$0xff]  ;;  %v261_v23 = vld [vmem:[%s995_s3 + $0x48] sm:$0xff]  ;;  %v260_v24 = vld [vmem:[%s995_s3 + $0x40] sm:$0xff] }
   0x9   :  { %673 = vmatprep.mubr.msk.f32.mxu0 %vm38_vm0, %v30_v5  ;;  %v263_v25 = vld [vmem:[%s995_s3 + $0x58] sm:$0xff]  ;;  %v262_v26 = vld [vmem:[%s995_s3 + $0x50] sm:$0xff] }
   0xa   :  { %281 = vperm.xlu1 %741, %v255_v17   ;;  %v241_v17 = vld [vmem:[%s994_s2 + $0x8] sm:$0xff] }
   0xb   :  { %271 = vperm.xlu0 %740, %v253_v18   ;;  %v242_v18 = vld [vmem:[%s994_s2 + $0x10] sm:$0xff] }
   0xc   :  { %674 = vmatmul.mubr.msk.f32.gmra.mrb[4].mxu0 %vm38_vm0, %v31_v6 }
   0xd   :  { %676 = vmatprep.mubr.msk.f32.mxu0 %vm38_vm0, %v32_v7 }
   0xe   :  { %291 = vperm.xlu1 %741, %v257_v19   ;;  %v243_v19 = vld [vmem:[%s994_s2 + $0x18] sm:$0xff] }
   0xf   :  { %286 = vperm.xlu0 %740, %v256_v20   ;;  %v244_v20 = vld [vmem:[%s994_s2 + $0x20] sm:$0xff] }
  0x10   :  { %677 = vmatmul.mubr.msk.f32.gmra.mrb[6].mxu0 %vm38_vm0, %v33_v8 }
  0x11   :  { %679 = vmatprep.mubr.msk.f32.mxu0 %vm38_vm0, %v34_v9 }
  0x12   :  { %301 = vperm.xlu1 %741, %v259_v21   ;;  %v245_v21 = vld [vmem:[%s994_s2 + $0x28] sm:$0xff] }
  0x13   :  { %296 = vperm.xlu0 %740, %v258_v22   ;;  %v246_v22 = vld [vmem:[%s994_s2 + $0x30] sm:$0xff] }
  0x14   :  { %680 = vmatmul.mubr.msk.f32.gmra.mrb[8].mxu0 %vm38_vm0, %v35_v10 }
  0x15   :  { %682 = vmatprep.mubr.msk.f32.mxu0 %vm38_vm0, %v36_v11 }
  0x16   :  { %311 = vperm.xlu1 %741, %v261_v23   ;;  %v247_v23 = vld [vmem:[%s994_s2 + $0x38] sm:$0xff] }
  0x17   :  { %306 = vperm.xlu0 %740, %v260_v24   ;;  %v248_v24 = vld [vmem:[%s994_s2 + $0x40] sm:$0xff] }
  0x18   :  { %683 = vmatmul.mubr.msk.f32.gmra.mrb[10].mxu0 %vm38_vm0, %v37_v12 }
  0x1a   :  { %321 = vperm.xlu1 %741, %v263_v25   ;;  %v249_v25 = vld [vmem:[%s994_s2 + $0x48] sm:$0xff] }
  0x1b   :  { %316 = vperm.xlu0 %740, %v262_v26   ;;  %v250_v26 = vld [vmem:[%s994_s2 + $0x50] sm:$0xff] }
  0xd7   :  { %v669_v27 = vpop.f32.mrb[0].mxu0 }
  0xd8   :  { %742 = vtanh.f32 %v669_v27  ;;  %v141_v28 = vpop.f32.mrb[1].mxu0  ;;  %v251_v27 = vld [vmem:[%s994_s2 + $0x58] sm:$0xff] }
  0xd9   :  { %744 = vtanh.f32 %v141_v28  ;;  %v807_v28 = vmov 0.0|0.0  }
  0xda   :  { %730 = vmatprep.subr.bf16.mxu0 %v807_v28 }
  0xdb   :  { %v672_v29 = vpop.f32.mrb[2].mxu0 }
  0xdc   :  { %746 = vtanh.f32 %v672_v29  ;;  %v151_v30 = vpop.f32.mrb[3].mxu0  ;;  %v809_v29 = vmov 0.0  }
  0xdd   :  { %748 = vtanh.f32 %v151_v30  ;;  %719 = vmatprep.mubr.msk.f32.mxu0 %vm808_vm2, %v809_v29  ;;  %v277_v30 = vpop.permute.xlu1 %276 }
  0xdf   :  { %v675_v31 = vpop.f32.mrb[4].mxu0 }
  0xe0   :  { %750 = vtanh.f32 %v675_v31  ;;  %v161_v32 = vpop.f32.mrb[5].mxu0  ;;  %v267_v31 = vpop.permute.xlu0 %266 }
  0xe1   :  { %752 = vtanh.f32 %v161_v32  ;;  %v282_v32 = vpop.permute.xlu1 %281 }
  0xe2   :  { %v743_v33 = vpop.eup %742 }
  0xe3   :  { %v745_v34 = vpop.eup %744  ;;  %v678_v35 = vpop.f32.mrb[6].mxu0  ;;  %v205_v37 = vmul.f32 0.5, %v743_v33 }
  0xe4   :  { %754 = vtanh.f32 %v678_v35  ;;  %v171_v36 = vpop.f32.mrb[7].mxu0  ;;  %v204_v39 = vmul.f32 0.5, %v745_v34  ;;  %v272_v33 = vpop.permute.xlu0 %271 }
  0xe5   :  { %756 = vtanh.f32 %v171_v36  ;;  %v209_v43 = vadd.f32 0.5, %v205_v37  ;;  %v292_v37 = vpop.permute.xlu1 %291 }
  0xe6   :  { %v747_v38 = vpop.eup %746  ;;  %v208_v46 = vadd.f32 0.5, %v204_v39 }
  0xe7   :  { %v749_v40 = vpop.eup %748  ;;  %v681_v41 = vpop.f32.mrb[8].mxu0  ;;  %v207_v44 = vmul.f32 0.5, %v747_v38 }
  0xe8   :  { %758 = vtanh.f32 %v681_v41  ;;  %v181_v42 = vpop.f32.mrb[9].mxu0  ;;  %v206_v47 = vmul.f32 0.5, %v749_v40  ;;  %v287_v39 = vpop.permute.xlu0 %286 }
  0xe9   :  { %760 = vtanh.f32 %v181_v42  ;;  %v211_v53 = vadd.f32 0.5, %v207_v44  ;;  %v302_v44 = vpop.permute.xlu1 %301 }
  0xea   :  { %v751_v45 = vpop.eup %750  ;;  %v210_v55 = vadd.f32 0.5, %v206_v47 }
  0xeb   :  { %v753_v48 = vpop.eup %752  ;;  %v229_v49 = vmul.f32 %v751_v45, %v209_v43  ;;  %v684_v50 = vpop.f32.mrb[10].mxu0 }
  0xec   :  { %v228_v51 = vmul.f32 %v753_v48, %v208_v46  ;;  %762 = vtanh.f32 %v684_v50  ;;  %v191_v52 = vpop.f32.mrb[11].mxu0  ;;  %v297_v46 = vpop.permute.xlu0 %296 }
  0xed   :  { %764 = vtanh.f32 %v229_v49 }
  0xee   :  { %v755_v54 = vpop.eup %754  ;;  %766 = vtanh.f32 %v228_v51 }
  0xef   :  { %v757_v56 = vpop.eup %756  ;;  %v231_v57 = vmul.f32 %v755_v54, %v211_v53  ;;  %768 = vtanh.f32 %v191_v52 }
  0xf0   :  { %v230_v58 = vmul.f32 %v757_v56, %v210_v55  ;;  %v312_v55 = vpop.permute.xlu1 %311 }
  0xf1   :  { %770 = vtanh.f32 %v231_v57  ;;  %v307_v57 = vpop.permute.xlu0 %306 }
  0xf2   :  { %v759_v59 = vpop.eup %758  ;;  %772 = vtanh.f32 %v230_v58 }
  0xf3   :  { %v761_v60 = vpop.eup %760  ;;  %v221_v61 = vmul.f32 0.5, %v759_v59 }
  0xf4   :  { %v220_v62 = vmul.f32 0.5, %v761_v60 }
  0xf5   :  { %v225_v63 = vadd.f32 0.5, %v221_v61 }
  0xf6   :  { %v763_v0 = vpop.eup %762  ;;  %v224_v1 = vadd.f32 0.5, %v220_v62 }
  0xf7   :  { %v765_v2 = vpop.eup %764  ;;  %v223_v3 = vmul.f32 0.5, %v763_v0 }
  0xf8   :  { %v767_v4 = vpop.eup %766  ;;  %v237_v5 = vmul.f32 %v765_v2, %v225_v63 }
  0xf9   :  { %v769_v6 = vpop.eup %768  ;;  %v227_v7 = vadd.f32 0.5, %v223_v3  ;;  %v236_v8 = vmul.f32 %v767_v4, %v224_v1  ;;  %v322_v3 = vpop.permute.xlu1 %321 }
  0xfa   :  { %v222_v9 = vmul.f32 0.5, %v769_v6 }
  0xfb   :  { %v771_v10 = vpop.eup %770  ;;  %v722_v11 = vpack.c.bf16 %v237_v5, %v236_v8 }
  0xfc   :  { %v773_v12 = vpop.eup %772  ;;  %v239_v13 = vmul.f32 %v771_v10, %v227_v7  ;;  %v226_v14 = vadd.f32 0.5, %v222_v9  ;;  %v317_v7 = vpop.permute.xlu0 %316 }
  0xfd   :  { %723 = vmatprep.subr.bf16.mxu1 %v722_v11 }
  0xfe   :  { %v238_v15 = vmul.f32 %v773_v12, %v226_v14  ;;  %725 = vmatpush3.bf16.msra.mxu1 %v722_v11 }
 0x100   :  { %v726_v16 = vpack.c.bf16 %v239_v13, %v238_v15 }
 0x102   :  { %727 = vmatprep.subr.bf16.mxu1 %v726_v16 }
 0x103   :  { %729 = vmatpush3.bf16.msra.mxu1 %v726_v16 }
 0x106   :  { %694 = vmatmul.mubr.msk.f32.vlgmr.msra.gmra.mrb[0].mxu1 %vm324_vm1, %v241_v17 }
 0x107   :  { %696 = vmatprep.mubr.msk.f32.mxu1 %vm324_vm1, %v242_v18 }
 0x10a   :  { %697 = vmatmul.mubr.msk.f32.gmra.mrb[2].mxu1 %vm324_vm1, %v243_v19 }
 0x10b   :  { %699 = vmatprep.mubr.msk.f32.mxu1 %vm324_vm1, %v244_v20 }
 0x10e   :  { %700 = vmatmul.mubr.msk.f32.gmra.mrb[4].mxu1 %vm324_vm1, %v245_v21 }
 0x10f   :  { %702 = vmatprep.mubr.msk.f32.mxu1 %vm324_vm1, %v246_v22 }
 0x112   :  { %703 = vmatmul.mubr.msk.f32.gmra.mrb[6].mxu1 %vm324_vm1, %v247_v23 }
 0x113   :  { %705 = vmatprep.mubr.msk.f32.mxu1 %vm324_vm1, %v248_v24 }
 0x116   :  { %706 = vmatmul.mubr.msk.f32.gmra.mrb[8].mxu1 %vm324_vm1, %v249_v25 }
 0x117   :  { %708 = vmatprep.mubr.msk.f32.mxu1 %vm324_vm1, %v250_v26 }
 0x11a   :  { %709 = vmatmul.mubr.msk.f32.gmra.mrb[10].mxu1 %vm324_vm1, %v251_v27 }
 0x1d9   :  { %v695_v34 = vpop.f32.mrb[0].mxu1 }
 0x1da   :  { %v433_v35 = vadd.f32 %v695_v34, %v272_v33  ;;  %v427_v36 = vpop.f32.mrb[1].mxu1 }
 0x1db   :  { %v428_v38 = vadd.f32 %v427_v36, %v267_v31 }
 0x1dc   :  { %774 = vtanh.f32 %v433_v35 }
 0x1dd   :  { %776 = vtanh.f32 %v428_v38  ;;  %v698_v40 = vpop.f32.mrb[2].mxu1 }
 0x1de   :  { %v443_v41 = vadd.f32 %v698_v40, %v282_v32  ;;  %v437_v42 = vpop.f32.mrb[3].mxu1 }
 0x1df   :  { %v438_v43 = vadd.f32 %v437_v42, %v277_v30 }
 0x1e0   :  { %778 = vtanh.f32 %v443_v41 }
 0x1e1   :  { %780 = vtanh.f32 %v438_v43  ;;  %v701_v45 = vpop.f32.mrb[4].mxu1 }
 0x1e2   :  { %v453_v47 = vadd.f32 %v701_v45, %v292_v37  ;;  %v447_v48 = vpop.f32.mrb[5].mxu1  ;;  %v526_v45 = vld [vmem:[%s996_s4] sm:$0x1] }
 0x1e3   :  { %v448_v49 = vadd.f32 %v447_v48, %v287_v39 }
 0x1e4   :  { %782 = vtanh.f32 %v453_v47 }
 0x1e5   :  { %784 = vtanh.f32 %v448_v49  ;;  %v704_v50 = vpop.f32.mrb[6].mxu1 }
 0x1e6   :  { %v775_v51 = vpop.eup %774  ;;  %v463_v52 = vadd.f32 %v704_v50, %v302_v44  ;;  %v457_v53 = vpop.f32.mrb[7].mxu1 }
 0x1e7   :  { %v777_v54 = vpop.eup %776  ;;  %v458_v56 = vadd.f32 %v457_v53, %v297_v46  ;;  %v491_v58 = vmul.f32 0.5, %v775_v51  ;;  %v527_v46 = vstv %s997_s5 }
 0x1e8   :  { %786 = vtanh.f32 %v463_v52  ;;  %v490_v61 = vmul.f32 0.5, %v777_v54 }
 0x1e9   :  { %788 = vtanh.f32 %v458_v56  ;;  %v707_v59 = vpop.f32.mrb[8].mxu1  ;;  %v495_v2 = vadd.f32 0.5, %v491_v58 }
 0x1ea   :  { %v779_v60 = vpop.eup %778  ;;  %v473_v62 = vadd.f32 %v707_v59, %v312_v55  ;;  %v467_v63 = vpop.f32.mrb[9].mxu1  ;;  %v494_v8 = vadd.f32 0.5, %v490_v61 }
 0x1eb   :  { %v781_v0 = vpop.eup %780  ;;  %v468_v1 = vadd.f32 %v467_v63, %v307_v57  ;;  %v493_v4 = vmul.f32 0.5, %v779_v60 }
 0x1ec   :  { %790 = vtanh.f32 %v473_v62  ;;  %v492_v9 = vmul.f32 0.5, %v781_v0 }
 0x1ed   :  { %792 = vtanh.f32 %v468_v1  ;;  %v710_v5 = vpop.f32.mrb[10].mxu1  ;;  %v497_v16 = vadd.f32 0.5, %v493_v4 }
 0x1ee   :  { %v783_v6 = vpop.eup %782  ;;  %v483_v10 = vadd.f32 %v710_v5, %v322_v3  ;;  %v477_v11 = vpop.f32.mrb[11].mxu1  ;;  %v496_v18 = vadd.f32 0.5, %v492_v9 }
 0x1ef   :  { %v785_v12 = vpop.eup %784  ;;  %v515_v13 = vmul.f32 %v783_v6, %v495_v2  ;;  %v478_v14 = vadd.f32 %v477_v11, %v317_v7 }
 0x1f0   :  { %v514_v15 = vmul.f32 %v785_v12, %v494_v8  ;;  %794 = vtanh.f32 %v483_v10 }
 0x1f1   :  { %796 = vtanh.f32 %v515_v13 }
 0x1f2   :  { %v787_v17 = vpop.eup %786  ;;  %798 = vtanh.f32 %v514_v15 }
 0x1f3   :  { %v789_v19 = vpop.eup %788  ;;  %v517_v20 = vmul.f32 %v787_v17, %v497_v16  ;;  %800 = vtanh.f32 %v478_v14 }
 0x1f4   :  { %v516_v21 = vmul.f32 %v789_v19, %v496_v18 }
 0x1f5   :  { %802 = vtanh.f32 %v517_v20 }
 0x1f6   :  { %v791_v22 = vpop.eup %790  ;;  %804 = vtanh.f32 %v516_v21 }
 0x1f7   :  { %v793_v23 = vpop.eup %792  ;;  %v507_v24 = vmul.f32 0.5, %v791_v22 }
 0x1f8   :  { %v506_v25 = vmul.f32 0.5, %v793_v23 }
 0x1f9   :  { %v511_v26 = vadd.f32 0.5, %v507_v24 }
 0x1fa   :  { %v795_v27 = vpop.eup %794  ;;  %v510_v29 = vadd.f32 0.5, %v506_v25 }
 0x1fb   :  { %v797_v30 = vpop.eup %796  ;;  %v509_v31 = vmul.f32 0.5, %v795_v27 }
 0x1fc   :  { %v799_v32 = vpop.eup %798  ;;  %v523_v33 = vmul.f32 %v797_v30, %v511_v26 }
 0x1fd   :  { %v801_v34 = vpop.eup %800  ;;  %v522_v35 = vmul.f32 %v799_v32, %v510_v29  ;;  %v513_v36 = vadd.f32 0.5, %v509_v31 }
 0x1fe   :  { %v508_v37 = vmul.f32 0.5, %v801_v34 }
 0x1ff   :  { %v803_v38 = vpop.eup %802  ;;  %v731_v39 = vpack.c.bf16 %v523_v33, %v522_v35 }
 0x200   :  { %v805_v40 = vpop.eup %804  ;;  %v525_v41 = vmul.f32 %v803_v38, %v513_v36  ;;  %v512_v42 = vadd.f32 0.5, %v508_v37 }
 0x201   :  { %732 = vmatpush3.bf16.msra.mxu0 %v731_v39 }
 0x202   :  { %v524_v43 = vmul.f32 %v805_v40, %v512_v42  ;;  %733 = vmatprep.subr.bf16.mxu0 %v807_v28 }
 0x204   :  { %v734_v44 = vpack.c.bf16 %v525_v41, %v524_v43 }
 0x206   :  { %735 = vmatpush3.bf16.msra.mxu0 %v734_v44 }
 0x209   :  { %720 = vmatmul.mubr.msk.f32.vlgmr.msra.gmra.mrb[12].mxu0 %vm324_vm1, %v526_v45 }
 0x2dc   :  { %v597_v47 = vpop.f32.mrb[12].mxu0 }
 0x2dd   :  { %v598_v48 = vadd.f32 %v597_v47, %v527_v46  ;;  %v721_v49 = vpop.f32.mrb[13].mxu0 }
 0x2df   :  { %601 = vst [vmem:[%s998_s6] sm:$0x1] %v598_v48 }

</bundles_post_ra>
